<compile_context>
chip_gen: v7x
topology: tpu7x:2x2x1
jax: 0.10.0
libtpu: 0.0.40
codegen_flags: <defaults>
</compile_context>

<pallas_src>
import functools

import jax
import jax.numpy as jnp
from jax.experimental import pallas as pl
from jax.experimental.pallas import tpu as pltpu

LANE = 128


def _round_up(x, m):
    return (x + m - 1) // m * m


def _cdiv(a, b):
    return (a + b - 1) // b


def _choose_tiles(num_nodes):
    """Pick (n_padded, tm, tk).

    Large tiles amortize the ~0.35us per-grid-step overhead of the HBM-bound
    aggregation; keep >= 2 row tiles so the "parallel" row axis feeds both v7x
    TensorCores; pad N to an exact multiple of both tiles so the grid's integer
    division never drops rows.
    """
    tm = 1024
    while tm > 128 and _cdiv(num_nodes, tm) < 2:
        tm //= 2
    n_row_tiles = max(_cdiv(num_nodes, tm), 2)
    n_padded = n_row_tiles * tm
    tk = min(2048, n_padded)
    while n_padded % tk:
        tk //= 2
    return n_padded, tm, tk


@functools.lru_cache(maxsize=None)
def _vmem_limit_bytes():
    # ~75% of physical VMEM: ~96 MiB on v5e/v6e (128 MiB), ~48 MiB on v7x (64 MiB).
    try:
        return int(pltpu.get_tpu_info().vmem_capacity_bytes * 3 // 4)
    except Exception:  # fall back to a limit that is safe on every generation
        return 48 * 1024 * 1024


# Activation is a constructor argument of the PyTorch Encoder; we support a
# static selection applied inside the kernel (ReLU is the canonical choice).
_ACTIVATIONS = {
    "relu": lambda x: jnp.maximum(x, 0.0),
    "elu": lambda x: jnp.where(x > 0, x, jnp.expm1(x)),
    "identity": lambda x: x,
}
# TODO(synk): PReLU (learnable slope) would need the slope passed as an extra
#             (1, Fout_p) operand; not implemented.


# ----------------------------------------------------------------------------
# Fused per-layer kernel:  H = act(Â @ (X @ W) + b)
#   grid = (N/tm rows [parallel], N/tk K-reduction [arbitrary, last])
#   Â tile streams from HBM (bf16); X / W / b are VMEM-resident (constant
#   index_map -> fetched once); f32 accumulator in VMEM scratch across K.
# ----------------------------------------------------------------------------
def _gcn_layer_kernel(a_ref, x_ref, w_ref, b_ref, o_ref, acc_ref, *, act_fn, tk):
    kk = pl.program_id(1)

    @pl.when(kk == 0)
    def _():
        acc_ref[...] = jnp.zeros_like(acc_ref)

    # On-the-fly feature transform for this K slab (MXU is mostly idle in the
    # mem-bound regime, so the recompute across row tiles is free).
    start = pl.multiple_of(kk * tk, tk)
    x_slab = x_ref[pl.ds(start, tk), :]                               # (tk, Fin_p) bf16
    xw = jnp.dot(x_slab, w_ref[...], preferred_element_type=jnp.float32)
    acc_ref[...] += jnp.dot(
        a_ref[...], xw.astype(jnp.bfloat16), preferred_element_type=jnp.float32)

    @pl.when(kk == pl.num_programs(1) - 1)
    def _():
        out = act_fn(acc_ref[...] + b_ref[...])       # b is (1, Fout_p), broadcasts
        o_ref[...] = out.astype(o_ref.dtype)


def gcn_layer(a_bf16, x_bf16, w_bf16, b_f32, *, activation, tm, tk, out_dtype):
    n_p = a_bf16.shape[0]
    fin_p = x_bf16.shape[1]
    fout_p = w_bf16.shape[1]
    kernel = functools.partial(
        _gcn_layer_kernel, act_fn=_ACTIVATIONS[activation], tk=tk)
    return pl.pallas_call(
        kernel,
        out_shape=jax.ShapeDtypeStruct((n_p, fout_p), out_dtype),
        grid_spec=pltpu.PrefetchScalarGridSpec(
            num_scalar_prefetch=0,
            grid=(n_p // tm, n_p // tk),
            in_specs=[
                pl.BlockSpec((tm, tk), lambda i, k: (i, k)),          # Â tile (bf16)
                pl.BlockSpec((n_p, fin_p), lambda i, k: (0, 0)),      # X resident (bf16)
                pl.BlockSpec((fin_p, fout_p), lambda i, k: (0, 0)),   # W resident (bf16)
                pl.BlockSpec((1, fout_p), lambda i, k: (0, 0)),       # bias (f32)
            ],
            out_specs=pl.BlockSpec((tm, fout_p), lambda i, k: (i, 0)),
            scratch_shapes=[pltpu.VMEM((tm, fout_p), jnp.float32)],
        ),
        compiler_params=pltpu.CompilerParams(
            dimension_semantics=("parallel", "arbitrary"),
            vmem_limit_bytes=_vmem_limit_bytes(),
        ),
    )(a_bf16, x_bf16, w_bf16, b_f32)


# ----------------------------------------------------------------------------
# Glue: symmetric-normalized dense adjacency (PyG GCNConv semantics: add
# self-loops, norm[e] = deg(dst)^-1/2 * deg(src)^-1/2).  Built ONCE, padded to
# the tile-aligned node count, stored bf16.  Padded rows/cols are all-zero.
# ----------------------------------------------------------------------------
def normalized_adjacency(edge_index, num_nodes, num_nodes_padded):
    src, dst = edge_index[0], edge_index[1]
    loop = jnp.arange(num_nodes, dtype=edge_index.dtype)
    src = jnp.concatenate([src, loop])
    dst = jnp.concatenate([dst, loop])
    a = jnp.zeros((num_nodes_padded, num_nodes_padded), jnp.float32)
    a = a.at[dst, src].add(1.0)
    deg = a.sum(axis=1)
    dinv = jnp.where(deg > 0, 1.0 / jnp.sqrt(deg), 0.0)
    a_norm = dinv[:, None] * a * dinv[None, :]
    return a_norm.astype(jnp.bfloat16)


# ----------------------------------------------------------------------------
# Encoder params:
#   layer 0:        in_channels    -> 2*out_channels
#   layers 1..k-2:  2*out_channels -> 2*out_channels
#   layer k-1:      2*out_channels -> out_channels
# ----------------------------------------------------------------------------
def init_encoder_params(key, in_channels, out_channels, k=2):
    assert k >= 2
    dims = [in_channels] + [2 * out_channels] * (k - 1) + [out_channels]
    params = []
    for i in range(k):
        key, wk = jax.random.split(key)
        fan_in, fan_out = dims[i], dims[i + 1]
        limit = jnp.sqrt(6.0 / (fan_in + fan_out))  # glorot-uniform (PyG default)
        w = jax.random.uniform(wk, (fan_in, fan_out), jnp.float32, -limit, limit)
        b = jnp.zeros((fan_out,), jnp.float32)      # PyG GCNConv bias init = zeros
        params.append((w, b))
    return params


def pad_params(params):
    """Zero-pad W/b so every feature dim is a lane multiple; W pre-cast to bf16
    (MXU operand, no per-tile convert in-kernel), bias kept f32 (1, Fout_p)."""
    padded = []
    for w, b in params:
        fin, fout = w.shape
        fin_p, fout_p = _round_up(fin, LANE), _round_up(fout, LANE)
        w_p = jnp.zeros((fin_p, fout_p), jnp.float32).at[:fin, :fout].set(w)
        b_p = jnp.zeros((1, fout_p), jnp.float32).at[0, :fout].set(b)
        padded.append((w_p.astype(jnp.bfloat16), b_p))
    return tuple(padded)


@functools.partial(jax.jit, static_argnames=("activation", "tm", "tk"))
def encoder_forward(x_padded_bf16, a_norm_bf16, padded_params, *, activation, tm, tk):
    x = x_padded_bf16
    n_layers = len(padded_params)
    for li, (w_p, b_p) in enumerate(padded_params):
        last = li == n_layers - 1
        # Intermediate activations stay in bf16 (halves HBM round-trips);
        # only the final layer is emitted in f32.
        x = gcn_layer(a_norm_bf16, x, w_p, b_p,
                      activation=activation, tm=tm, tk=tk,
                      out_dtype=jnp.float32 if last else jnp.bfloat16)
    return x


if __name__ == "__main__":
    key = jax.random.PRNGKey(0)

    # Small deterministic problem: 16 nodes, undirected ring, k=2 layers.
    num_nodes = 16
    in_channels = 8
    out_channels = 16
    k = 2
    activation = "relu"

    k_x, k_p = jax.random.split(key)
    x = jax.random.normal(k_x, (num_nodes, in_channels), jnp.float32)

    fwd = jnp.arange(num_nodes, dtype=jnp.int32)
    src = jnp.concatenate([fwd, (fwd + 1) % num_nodes])
    dst = jnp.concatenate([(fwd + 1) % num_nodes, fwd])
    edge_index = jnp.stack([src, dst], axis=0)  # [2, 2N]

    params = init_encoder_params(k_p, in_channels, out_channels, k=k)
    padded_params = pad_params(params)

    # Tile selection: big tiles, >=2 row tiles, N padded to an exact multiple.
    n_padded, tm, tk = _choose_tiles(num_nodes)

    fin_padded = _round_up(in_channels, LANE)
    x_padded = jnp.zeros((n_padded, fin_padded), jnp.float32)
    x_padded = x_padded.at[:num_nodes, :in_channels].set(x).astype(jnp.bfloat16)

    # Â built once (hoisted out of the per-forward path) and reused every layer.
    a_norm = normalized_adjacency(edge_index, num_nodes, n_padded)

    out_padded = encoder_forward(
        x_padded, a_norm, padded_params,
        activation=activation, tm=tm, tk=tk)
    out = out_padded[:num_nodes, :out_channels]
    jax.block_until_ready(out)
    assert out.shape == (num_nodes, out_channels), out.shape

    # Pure-JAX f32 reference (loose tolerance: Â / X / W / intermediate
    # activations go through the MXU in bf16).
    def ref_forward(xr, ei):
        s, d = ei[0], ei[1]
        lp = jnp.arange(num_nodes, dtype=ei.dtype)
        s = jnp.concatenate([s, lp])
        d = jnp.concatenate([d, lp])
        a = jnp.zeros((num_nodes, num_nodes), jnp.float32).at[d, s].add(1.0)
        deg = a.sum(axis=1)
        dinv = jnp.where(deg > 0, 1.0 / jnp.sqrt(deg), 0.0)
        an = dinv[:, None] * a * dinv[None, :]
        h = xr
        for w, b in params:
            h = jnp.maximum(an @ (h @ w) + b[None, :], 0.0)
        return h

    ref_out = ref_forward(x, edge_index)
    err = float(jnp.max(jnp.abs(out - ref_out)))
    scale = float(jnp.max(jnp.abs(ref_out))) + 1e-6
    assert err <= 5e-2 + 5e-2 * scale, (err, scale)

    print("KERNEL_OK")
</pallas_src>

<mosaic_0001>
module attributes {stable_mosaic.version = 11 : i64} {
  func.func @_gcn_layer_kernel(%arg0: i32, %arg1: i32, %arg2: memref<128x256xbf16, #tpu.memory_space<vmem>>, %arg3: memref<256x128xbf16, #tpu.memory_space<vmem>>, %arg4: memref<128x128xbf16, #tpu.memory_space<vmem>>, %arg5: memref<1x128xf32, #tpu.memory_space<vmem>>, %arg6: memref<128x128xbf16, #tpu.memory_space<vmem>>, %arg7: memref<128x128xf32, #tpu.memory_space<vmem>>) attributes {dimension_semantics = [#tpu.dimension_semantics<parallel>, #tpu.dimension_semantics<arbitrary>], iteration_bounds = array<i64: 2, 1>, scalar_prefetch = 0 : i64, scratch_operands = 1 : i64, tpu.core_type = #tpu.core_type<tc>, window_params = [{transform_indices = @transform_0, window_bounds = array<i64: 128, 256>}, {pipeline_mode = #tpu.pipeline_mode<synchronous>, transform_indices = @transform_1, window_bounds = array<i64: 256, 128>}, {pipeline_mode = #tpu.pipeline_mode<synchronous>, transform_indices = @transform_2, window_bounds = array<i64: 128, 128>}, {pipeline_mode = #tpu.pipeline_mode<synchronous>, transform_indices = @transform_3, window_bounds = array<i64: 1, 128>}, {transform_indices = @transform_4, window_bounds = array<i64: 128, 128>}]} {
    %c0_i32 = arith.constant 0 : i32
    %0 = arith.cmpi eq, %arg1, %c0_i32 : i32
    %1 = arith.extui %0 : i1 to i32
    %c0_i32_0 = arith.constant 0 : i32
    %2 = arith.cmpi ne, %1, %c0_i32_0 : i32
    scf.if %2 {
      %cst_12 = arith.constant 0.000000e+00 : f32
      %18 = vector.broadcast %cst_12 : f32 to vector<128x128xf32>
      %c0_13 = arith.constant 0 : index
      %c0_14 = arith.constant 0 : index
      %19 = vector.load %arg7[%c0_13, %c0_14] : memref<128x128xf32, #tpu.memory_space<vmem>>, vector<128x128xf32>
      tpu.vector_store %arg7[%c0_13, %c0_14], %18 {strides = array<i32>} : memref<128x128xf32, #tpu.memory_space<vmem>>, vector<128x128xf32>,
    } else {
    }
    %c256_i32 = arith.constant 256 : i32
    %3 = arith.muli %arg1, %c256_i32 : i32
    %4 = tpu.assume_multiple %3, 256 : i32
    %5 = arith.index_cast %4 : i32 to index
    %c0 = arith.constant 0 : index
    %6 = vector.load %arg3[%5, %c0] : memref<256x128xbf16, #tpu.memory_space<vmem>>, vector<256x128xbf16>
    %c0_1 = arith.constant 0 : index
    %c0_2 = arith.constant 0 : index
    %7 = vector.load %arg4[%c0_1, %c0_2] : memref<128x128xbf16, #tpu.memory_space<vmem>>, vector<128x128xbf16>
    %cst = arith.constant dense<0.000000e+00> : vector<256x128xf32>
    %8 = tpu.matmul %6, %7, %cst {dimension_numbers = #tpu.dot_dimension_numbers<[1], [0], [0], [1], [0, 0, 1, 1], [], []>} : vector<256x128xbf16>, vector<128x128xbf16>, vector<256x128xf32> -> vector<256x128xf32>
    %c0_3 = arith.constant 0 : index
    %c0_4 = arith.constant 0 : index
    %9 = vector.load %arg7[%c0_3, %c0_4] : memref<128x128xf32, #tpu.memory_space<vmem>>, vector<128x128xf32>
    %c0_5 = arith.constant 0 : index
    %c0_6 = arith.constant 0 : index
    %10 = vector.load %arg2[%c0_5, %c0_6] : memref<128x256xbf16, #tpu.memory_space<vmem>>, vector<128x256xbf16>
    %11 = arith.truncf %8 : vector<256x128xf32> to vector<256x128xbf16>
    %cst_7 = arith.constant dense<0.000000e+00> : vector<128x128xf32>
    %12 = tpu.matmul %10, %11, %cst_7 {dimension_numbers = #tpu.dot_dimension_numbers<[1], [0], [0], [1], [0, 0, 1, 1], [], []>} : vector<128x256xbf16>, vector<256x128xbf16>, vector<128x128xf32> -> vector<128x128xf32>
    %13 = arith.addf %9, %12 : vector<128x128xf32>
    %c0_8 = arith.constant 0 : index
    %c0_9 = arith.constant 0 : index
    %14 = vector.load %arg7[%c0_8, %c0_9] : memref<128x128xf32, #tpu.memory_space<vmem>>, vector<128x128xf32>
    tpu.vector_store %arg7[%c0_8, %c0_9], %13 {strides = array<i32>} : memref<128x128xf32, #tpu.memory_space<vmem>>, vector<128x128xf32>,
    %c0_i32_10 = arith.constant 0 : i32
    %15 = arith.cmpi eq, %arg1, %c0_i32_10 : i32
    %16 = arith.extui %15 : i1 to i32
    %c0_i32_11 = arith.constant 0 : i32
    %17 = arith.cmpi ne, %16, %c0_i32_11 : i32
    scf.if %17 {
      %c0_12 = arith.constant 0 : index
      %c0_13 = arith.constant 0 : index
      %18 = vector.load %arg7[%c0_12, %c0_13] : memref<128x128xf32, #tpu.memory_space<vmem>>, vector<128x128xf32>
      %c0_14 = arith.constant 0 : index
      %c0_15 = arith.constant 0 : index
      %19 = vector.load %arg5[%c0_14, %c0_15] : memref<1x128xf32, #tpu.memory_space<vmem>>, vector<1x128xf32>
      %20 = vector.broadcast %19 : vector<1x128xf32> to vector<128x128xf32>
      %21 = arith.addf %18, %20 : vector<128x128xf32>
      %cst_16 = arith.constant 0.000000e+00 : f32
      %22 = vector.broadcast %cst_16 : f32 to vector<128x128xf32>
      %23 = arith.maximumf %21, %22 : vector<128x128xf32>
      %24 = arith.truncf %23 : vector<128x128xf32> to vector<128x128xbf16>
      %c0_17 = arith.constant 0 : index
      %c0_18 = arith.constant 0 : index
      %25 = vector.load %arg6[%c0_17, %c0_18] : memref<128x128xbf16, #tpu.memory_space<vmem>>, vector<128x128xbf16>
      tpu.vector_store %arg6[%c0_17, %c0_18], %24 {strides = array<i32>} : memref<128x128xbf16, #tpu.memory_space<vmem>>, vector<128x128xbf16>,
    } else {
    }
    return
  }
  func.func @transform_0(%arg0: i32, %arg1: i32) -> (i32, i32) {
    %c0_i32 = arith.constant 0 : i32
    return %arg0, %arg1 : i32, i32
  }
  func.func @transform_1(%arg0: i32, %arg1: i32) -> (i32, i32) {
    %c0_i32 = arith.constant 0 : i32
    %c0_i32_0 = arith.constant 0 : i32
    %c0_i32_1 = arith.constant 0 : i32
    return %c0_i32, %c0_i32_0 : i32, i32
  }
  func.func @transform_2(%arg0: i32, %arg1: i32) -> (i32, i32) {
    %c0_i32 = arith.constant 0 : i32
    %c0_i32_0 = arith.constant 0 : i32
    %c0_i32_1 = arith.constant 0 : i32
    return %c0_i32, %c0_i32_0 : i32, i32
  }
  func.func @transform_3(%arg0: i32, %arg1: i32) -> (i32, i32) {
    %c0_i32 = arith.constant 0 : i32
    %c0_i32_0 = arith.constant 0 : i32
    %c0_i32_1 = arith.constant 0 : i32
    return %c0_i32, %c0_i32_0 : i32, i32
  }
  func.func @transform_4(%arg0: i32, %arg1: i32) -> (i32, i32) {
    %c0_i32 = arith.constant 0 : i32
    %c0_i32_0 = arith.constant 0 : i32
    return %arg0, %c0_i32 : i32, i32
  }
}

module attributes {stable_mosaic.version = 11 : i64} {
  func.func @_gcn_layer_kernel(%arg0: i32, %arg1: i32, %arg2: memref<128x256xbf16, #tpu.memory_space<vmem>>, %arg3: memref<256x128xbf16, #tpu.memory_space<vmem>>, %arg4: memref<128x128xbf16, #tpu.memory_space<vmem>>, %arg5: memref<1x128xf32, #tpu.memory_space<vmem>>, %arg6: memref<128x128xf32, #tpu.memory_space<vmem>>, %arg7: memref<128x128xf32, #tpu.memory_space<vmem>>) attributes {dimension_semantics = [#tpu.dimension_semantics<parallel>, #tpu.dimension_semantics<arbitrary>], iteration_bounds = array<i64: 2, 1>, scalar_prefetch = 0 : i64, scratch_operands = 1 : i64, tpu.core_type = #tpu.core_type<tc>, window_params = [{transform_indices = @transform_0, window_bounds = array<i64: 128, 256>}, {pipeline_mode = #tpu.pipeline_mode<synchronous>, transform_indices = @transform_1, window_bounds = array<i64: 256, 128>}, {pipeline_mode = #tpu.pipeline_mode<synchronous>, transform_indices = @transform_2, window_bounds = array<i64: 128, 128>}, {pipeline_mode = #tpu.pipeline_mode<synchronous>, transform_indices = @transform_3, window_bounds = array<i64: 1, 128>}, {transform_indices = @transform_4, window_bounds = array<i64: 128, 128>}]} {
    %c0_i32 = arith.constant 0 : i32
    %0 = arith.cmpi eq, %arg1, %c0_i32 : i32
    %1 = arith.extui %0 : i1 to i32
    %c0_i32_0 = arith.constant 0 : i32
    %2 = arith.cmpi ne, %1, %c0_i32_0 : i32
    scf.if %2 {
      %cst_12 = arith.constant 0.000000e+00 : f32
      %18 = vector.broadcast %cst_12 : f32 to vector<128x128xf32>
      %c0_13 = arith.constant 0 : index
      %c0_14 = arith.constant 0 : index
      %19 = vector.load %arg7[%c0_13, %c0_14] : memref<128x128xf32, #tpu.memory_space<vmem>>, vector<128x128xf32>
      tpu.vector_store %arg7[%c0_13, %c0_14], %18 {strides = array<i32>} : memref<128x128xf32, #tpu.memory_space<vmem>>, vector<128x128xf32>,
    } else {
    }
    %c256_i32 = arith.constant 256 : i32
    %3 = arith.muli %arg1, %c256_i32 : i32
    %4 = tpu.assume_multiple %3, 256 : i32
    %5 = arith.index_cast %4 : i32 to index
    %c0 = arith.constant 0 : index
    %6 = vector.load %arg3[%5, %c0] : memref<256x128xbf16, #tpu.memory_space<vmem>>, vector<256x128xbf16>
    %c0_1 = arith.constant 0 : index
    %c0_2 = arith.constant 0 : index
    %7 = vector.load %arg4[%c0_1, %c0_2] : memref<128x128xbf16, #tpu.memory_space<vmem>>, vector<128x128xbf16>
    %cst = arith.constant dense<0.000000e+00> : vector<256x128xf32>
    %8 = tpu.matmul %6, %7, %cst {dimension_numbers = #tpu.dot_dimension_numbers<[1], [0], [0], [1], [0, 0, 1, 1], [], []>} : vector<256x128xbf16>, vector<128x128xbf16>, vector<256x128xf32> -> vector<256x128xf32>
    %c0_3 = arith.constant 0 : index
    %c0_4 = arith.constant 0 : index
    %9 = vector.load %arg7[%c0_3, %c0_4] : memref<128x128xf32, #tpu.memory_space<vmem>>, vector<128x128xf32>
    %c0_5 = arith.constant 0 : index
    %c0_6 = arith.constant 0 : index
    %10 = vector.load %arg2[%c0_5, %c0_6] : memref<128x256xbf16, #tpu.memory_space<vmem>>, vector<128x256xbf16>
    %11 = arith.truncf %8 : vector<256x128xf32> to vector<256x128xbf16>
    %cst_7 = arith.constant dense<0.000000e+00> : vector<128x128xf32>
    %12 = tpu.matmul %10, %11, %cst_7 {dimension_numbers = #tpu.dot_dimension_numbers<[1], [0], [0], [1], [0, 0, 1, 1], [], []>} : vector<128x256xbf16>, vector<256x128xbf16>, vector<128x128xf32> -> vector<128x128xf32>
    %13 = arith.addf %9, %12 : vector<128x128xf32>
    %c0_8 = arith.constant 0 : index
    %c0_9 = arith.constant 0 : index
    %14 = vector.load %arg7[%c0_8, %c0_9] : memref<128x128xf32, #tpu.memory_space<vmem>>, vector<128x128xf32>
    tpu.vector_store %arg7[%c0_8, %c0_9], %13 {strides = array<i32>} : memref<128x128xf32, #tpu.memory_space<vmem>>, vector<128x128xf32>,
    %c0_i32_10 = arith.constant 0 : i32
    %15 = arith.cmpi eq, %arg1, %c0_i32_10 : i32
    %16 = arith.extui %15 : i1 to i32
    %c0_i32_11 = arith.constant 0 : i32
    %17 = arith.cmpi ne, %16, %c0_i32_11 : i32
    scf.if %17 {
      %c0_12 = arith.constant 0 : index
      %c0_13 = arith.constant 0 : index
      %18 = vector.load %arg7[%c0_12, %c0_13] : memref<128x128xf32, #tpu.memory_space<vmem>>, vector<128x128xf32>
      %c0_14 = arith.constant 0 : index
      %c0_15 = arith.constant 0 : index
      %19 = vector.load %arg5[%c0_14, %c0_15] : memref<1x128xf32, #tpu.memory_space<vmem>>, vector<1x128xf32>
      %20 = vector.broadcast %19 : vector<1x128xf32> to vector<128x128xf32>
      %21 = arith.addf %18, %20 : vector<128x128xf32>
      %cst_16 = arith.constant 0.000000e+00 : f32
      %22 = vector.broadcast %cst_16 : f32 to vector<128x128xf32>
      %23 = arith.maximumf %21, %22 : vector<128x128xf32>
      %c0_17 = arith.constant 0 : index
      %c0_18 = arith.constant 0 : index
      %24 = vector.load %arg6[%c0_17, %c0_18] : memref<128x128xf32, #tpu.memory_space<vmem>>, vector<128x128xf32>
      tpu.vector_store %arg6[%c0_17, %c0_18], %23 {strides = array<i32>} : memref<128x128xf32, #tpu.memory_space<vmem>>, vector<128x128xf32>,
    } else {
    }
    return
  }
  func.func @transform_0(%arg0: i32, %arg1: i32) -> (i32, i32) {
    %c0_i32 = arith.constant 0 : i32
    return %arg0, %arg1 : i32, i32
  }
  func.func @transform_1(%arg0: i32, %arg1: i32) -> (i32, i32) {
    %c0_i32 = arith.constant 0 : i32
    %c0_i32_0 = arith.constant 0 : i32
    %c0_i32_1 = arith.constant 0 : i32
    return %c0_i32, %c0_i32_0 : i32, i32
  }
  func.func @transform_2(%arg0: i32, %arg1: i32) -> (i32, i32) {
    %c0_i32 = arith.constant 0 : i32
    %c0_i32_0 = arith.constant 0 : i32
    %c0_i32_1 = arith.constant 0 : i32
    return %c0_i32, %c0_i32_0 : i32, i32
  }
  func.func @transform_3(%arg0: i32, %arg1: i32) -> (i32, i32) {
    %c0_i32 = arith.constant 0 : i32
    %c0_i32_0 = arith.constant 0 : i32
    %c0_i32_1 = arith.constant 0 : i32
    return %c0_i32, %c0_i32_0 : i32, i32
  }
  func.func @transform_4(%arg0: i32, %arg1: i32) -> (i32, i32) {
    %c0_i32 = arith.constant 0 : i32
    %c0_i32_0 = arith.constant 0 : i32
    return %arg0, %c0_i32 : i32, i32
  }
}

</mosaic_0001>

<bundles_post_ra>
// kernel: encoder_forward.3
= control target key start
LH: loop header
LB: loop body
LE: loop exit
PB: predicated region body
PF: predicated region fallthrough
CT: control target
= control target key end

     0   :  { %9 = vsyncpa [#allocation4], 0  ;;  %s1686_s0 = inlined_call_operand.vmem [shape: bf16[256,256], index: 0, kind: input, shape index: {}]   ;;  %s1687_s1 = inlined_call_operand.vmem [shape: bf16[256,128], index: 1, kind: input, shape index: {}]   ;;  %s1688_s2 = inlined_call_operand.vmem [shape: bf16[128,128], index: 2, kind: input, shape index: {}]   ;;  %s1689_s3 = inlined_call_operand.vmem [shape: f32[1,128], index: 3, kind: input, shape index: {}]   ;;  %s1690_s4 = inlined_call_operand.hbm [shape: f32[256,128], index: 4, kind: output, shape index: {}]  }
   0x1   :  { %11 = vsyncpa [#allocation4 + $0x1], 0  ;;  %s1438_s15 = smov 0   ;;  %s1440_s16 = smov 0  }
   0x2   :  { %s1442_s17 = smov 0   ;;  %s1444_s18 = smov 0  }
   0x3   :  { %s1446_s19 = smov 0   ;;  %s1448_s20 = smov 0  }
   0x4 LB: > { %s1032_s21 = sadd.s32 4294967295, %s1408_s20   ;;  %s1033_s22 = sadd.s32 4294967294, %s1408_s20   ;;  %s1408_s20 = sphi %s1448_s20, %s17_s20   ;;  %s1404_s19 = sphi %s1446_s19, %s1697_s19   ;;  %s1400_s18 = sphi %s1444_s18, %s1696_s18   ;;  %s1396_s17 = sphi %s1442_s17, %s1695_s17   ;;  %s1392_s16 = sphi %s1440_s16, %s1694_s16   ;;  %s1388_s15 = sphi %s1438_s15, %s1693_s15  }
   0x5   : > { %s29_s23 = sadd.s32 1, %s1404_s19  ;;  %s127_s24 = sadd.s32 1, %s1396_s17 }
   0x6   : > { %p31_p0 = scmp.ge.s32.totalorder %s29_s23, 2  ;;  %p137_p1 = scmp.ne.s32.totalorder %s1396_s17, %s1392_s16 }
   0x7   : > { %p138_p2 = scmp.eq.s32.totalorder %s1032_s21, 1  ;;  %p143_p3 = scmp.ne.s32.totalorder %s1392_s16, %s1388_s15 }
   0x8   : > { %s1699_s23 = smov (%p31_p0, %s29_s23), 0  ;;  %p144_p5 = scmp.eq.s32.totalorder %s1033_s22, 1 }
   0x9   : > { %p1478_p4 = por %p138_p2, %p137_p1  ;;  %s124_s26 = ssub.s32 %s1404_s19, %s1699_s23 }
   0xa   : > { %p1036_p6 = scmp.ge.s32.totalorder %s1408_s20, 1  ;;  %p125_p7 = scmp.eq.s32.totalorder %s124_s26, 0 }
   0xb   : > { %p1485_p8 = por %p144_p5, %p143_p3  ;;  %p186_p9 = scmp.lt.s32.totalorder %s1408_s20, 3 }
   0xc   : > { %s1491_s28 = scalar_select %p125_p7, %s1396_s17, %s127_s24  }
   0xd   : > { %p187_p10 = pnand %p1036_p6, %p186_p9 }
   0xe   : > { %v1282_v0 = vld [vmem:[%s1688_s2] sm:$0xff] (!%p187_p10)   ;;  %v1283_v1 = vld [vmem:[%s1688_s2 + $0x8] sm:$0xff] (!%p187_p10)   ;;  %v1284_v2 = vld [vmem:[%s1688_s2 + $0x10] sm:$0xff] (!%p187_p10)   ;;  %s1038_s29 = sshll.u32 (!%p187_p10), %s1400_s18, 4  ;;  %s214_s8 = sand.u32 (!%p187_p10), 1, %s1392_s16  }
   0xf   : > { %190 = sbr.rel (%p187_p10) target bundleno = 620 (0x26c), region = 36  ;;  %1177 = vmatprep.subr.bf16.mxu0 (!%p187_p10), %v1282_v0  ;;  %v1285_v3 = vld [vmem:[%s1688_s2 + $0x18] sm:$0xff] (!%p187_p10)   ;;  %v1290_v4 = vld [vmem:[%s1687_s1] sm:$0xff] (!%p187_p10)   ;;  %v1287_v6 = vld [vmem:[%s1688_s2 + $0x28] sm:$0xff] (!%p187_p10)   ;;  %p219_p11 = scmp.lt.s32.totalorder (!%p187_p10), %s1038_s29, 31 }
  0x10   : > { %1178 = vmatpush3.bf16.msra.mxu0 (!%p187_p10), %v1282_v0  ;;  %1193 = vmatprep.mubr.bf16.mxu0 (!%p187_p10), %v1290_v4  ;;  %v1286_v5 = vld [vmem:[%s1688_s2 + $0x20] sm:$0xff] (!%p187_p10)   ;;  %v1288_v7 = vld [vmem:[%s1688_s2 + $0x30] sm:$0xff] (!%p187_p10)   ;;  %v1289_v8 = vld [vmem:[%s1688_s2 + $0x38] sm:$0xff] (!%p187_p10)   ;;  %s1037_s11 = sshll.u32 (!%p187_p10), %s214_s8, 7  ;;  %s1088_s13 = sshll.u32 (!%p187_p10), %s1400_s18, 11 }
  0x11   : > { %1179 = vmatprep.subr.bf16.mxu0 (!%p187_p10), %v1283_v1  ;;  %v1291_v9 = vld [vmem:[%s1687_s1 + $0x8] sm:$0xff] (!%p187_p10)   ;;  %v1292_v10 = vld [vmem:[%s1687_s1 + $0x10] sm:$0xff] (!%p187_p10)   ;;  %v1293_v11 = vld [vmem:[%s1687_s1 + $0x18] sm:$0xff] (!%p187_p10)   ;;  %s1597_s12 = scalar_lea.vmem (!%p187_p10), [#allocation3], %s1037_s11  ;;  %s1632_s24 = scalar_lea.hbm (!%p187_p10), %s1690_s4, %s1088_s13 }
  0x12   : > { %v1294_v12 = vld [vmem:[%s1687_s1 + $0x20] sm:$0xff] (!%p187_p10)   ;;  %v1295_v13 = vld [vmem:[%s1687_s1 + $0x28] sm:$0xff] (!%p187_p10)   ;;  %v1296_v14 = vld [vmem:[%s1687_s1 + $0x30] sm:$0xff] (!%p187_p10)   ;;  %s954_s14 = sshll.u32 (!%p187_p10), %s1597_s12, 4  ;;  %s1640_s26 = scalar_lea.sflag (!%p187_p10), [#allocation4], %s214_s8  ;;  %s1634_s14 = int_to_ptr.vmem [resolvable:$true] %s954_s14 }
  0x13   : > { %v1297_v15 = vld [vmem:[%s1687_s1 + $0x38] sm:$0xff] (!%p187_p10)   ;;  %v1298_v16 = vld [vmem:[%s1687_s1 + $0x40] sm:$0xff] (!%p187_p10)   ;;  %v1299_v17 = vld [vmem:[%s1687_s1 + $0x48] sm:$0xff] (!%p187_p10)   ;;  %s1330_s18 = scalar_lea.vmem (!%p187_p10), %s1634_s14, 2048 }
  0x14   : > { %1180 = vmatpush3.bf16.msra.mxu0 (!%p187_p10), %v1283_v1  ;;  %v1300_v18 = vld [vmem:[%s1687_s1 + $0x50] sm:$0xff] (!%p187_p10)   ;;  %v1301_v19 = vld [vmem:[%s1687_s1 + $0x58] sm:$0xff] (!%p187_p10)   ;;  %v1302_v20 = vld [vmem:[%s1687_s1 + $0x60] sm:$0xff] (!%p187_p10)   ;;  %p1331_p12 = scmp.ne.s32.totalorder (!%p187_p10), %s1634_s14, %s1330_s18 }
  0x15   : > { %1181 = vmatprep.subr.bf16.mxu0 (!%p187_p10), %v1284_v2  ;;  %v1303_v21 = vld [vmem:[%s1687_s1 + $0x68] sm:$0xff] (!%p187_p10)   ;;  %v1304_v22 = vld [vmem:[%s1687_s1 + $0x70] sm:$0xff] (!%p187_p10)   ;;  %v1305_v23 = vld [vmem:[%s1687_s1 + $0x78] sm:$0xff] (!%p187_p10)  }
  0x16   : > { %s1701_s29 = smov (!%p219_p11, %s1038_s29), 31  ;;  %p1332_p13 = pnand %p1331_p12, %p1478_p4 }
  0x17   : > { %s1087_s30 = sshll.u32 %s1701_s29, 3  ;;  %s1410_s29 = smov [#allocation3]  }
  0x18   : > { %1182 = vmatpush3.bf16.msra.mxu0 %v1284_v2  ;;  %s1569_s7 = scalar_lea.vmem %s1686_s0, %s1087_s30  ;;  %p1333_p0 = pneg %p1332_p13 }
  0x19   : > { %1183 = vmatprep.subr.bf16.mxu0 %v1285_v3  ;;  %v1308_v24 = vld [vmem:[%s1569_s7 + $0x4] ss:$8 sps:$4 sm:$0xff]   ;;  %s1334_s30 = sshll.u32 %s1410_s29, 4  ;;  %s1335_s30 = int_to_ptr.vmem [resolvable:$false] %s1334_s30 }
  0x1a   : > { %769 = vmatprep.mubr.bf16.mxu1 %v1308_v24  ;;  %s1336_s5 = scalar_lea.vmem %s1335_s30, 4096  ;;  %p1337_p1 = scmp.lt.s32.totalorder %s1634_s14, %s1335_s30 }
  0x1b   : > { %p1338_p2 = scmp.lt.s32.totalorder %s1336_s5, %s1330_s18 }
  0x1c   : > { %1184 = vmatpush3.bf16.msra.mxu0 %v1285_v3 }
  0x1d   : > { %1185 = vmatprep.subr.bf16.mxu0 %v1286_v5  ;;  %p1339_p3 = por %p1338_p2, %p1337_p1 }
  0x1f   : > { %p1340_p5 = pnand %p1339_p3, %p1333_p0 }
  0x20   : > { %1186 = vmatpush3.bf16.msra.mxu0 %v1286_v5 }
  0x21   : > { %1187 = vmatprep.subr.bf16.mxu0 %v1287_v6 }
  0x24   : > { %1188 = vmatpush3.bf16.msra.mxu0 %v1287_v6 }
  0x25   : > { %1189 = vmatprep.subr.bf16.mxu0 %v1288_v7 }
  0x28   : > { %1190 = vmatpush3.bf16.msra.mxu0 %v1288_v7 }
  0x29   : > { %1191 = vmatprep.subr.bf16.mxu0 %v1289_v8 }
  0x2c   : > { %1192 = vmatpush3.bf16.msra.mxu0 %v1289_v8 }
  0x2f   : > { %1194 = vmatmul.mubr.bf16.vlgmr.msra.gmra.mrb[0].mxu0 %v1291_v9  ;;  %v1306_v9 = vld [vmem:[%s1569_s7] ss:$8 sps:$4 sm:$0xff]  }
  0x30   : > { %1197 = vmatprep.mubr.bf16.mxu0 %v1292_v10  ;;  %v1309_v10 = vld [vmem:[%s1569_s7 + $0x14] ss:$8 sps:$4 sm:$0xff]  }
  0x37   : > { %1198 = vmatmul.mubr.bf16.gmra.mrb[4].mxu0 %v1293_v11  ;;  %v1311_v11 = vld [vmem:[%s1569_s7 + $0x10] ss:$8 sps:$4 sm:$0xff]  }
  0x38   : > { %1201 = vmatprep.mubr.bf16.mxu0 %v1294_v12  ;;  %v1312_v12 = vld [vmem:[%s1569_s7 + $0x24] ss:$8 sps:$4 sm:$0xff]  }
  0x3f   : > { %1202 = vmatmul.mubr.bf16.gmra.mrb[8].mxu0 %v1295_v13  ;;  %v1314_v13 = vld [vmem:[%s1569_s7 + $0x20] ss:$8 sps:$4 sm:$0xff]  }
  0x40   : > { %1205 = vmatprep.mubr.bf16.mxu0 %v1296_v14  ;;  %v1315_v14 = vld [vmem:[%s1569_s7 + $0x34] ss:$8 sps:$4 sm:$0xff]  }
  0x47   : > { %1206 = vmatmul.mubr.bf16.gmra.mrb[12].mxu0 %v1297_v15  ;;  %v1317_v15 = vld [vmem:[%s1569_s7 + $0x30] ss:$8 sps:$4 sm:$0xff]  }
  0x48   : > { %1209 = vmatprep.mubr.bf16.mxu0 %v1298_v16  ;;  %v1318_v16 = vld [vmem:[%s1569_s7 + $0x44] ss:$8 sps:$4 sm:$0xff]  }
  0x4f   : > { %1210 = vmatmul.mubr.bf16.gmra.mrb[16].mxu0 %v1299_v17  ;;  %v1320_v17 = vld [vmem:[%s1569_s7 + $0x40] ss:$8 sps:$4 sm:$0xff]  }
  0x50   : > { %1213 = vmatprep.mubr.bf16.mxu0 %v1300_v18  ;;  %v1321_v18 = vld [vmem:[%s1569_s7 + $0x54] ss:$8 sps:$4 sm:$0xff]  }
  0x57   : > { %1214 = vmatmul.mubr.bf16.gmra.mrb[20].mxu0 %v1301_v19  ;;  %v1323_v19 = vld [vmem:[%s1569_s7 + $0x50] ss:$8 sps:$4 sm:$0xff]  }
  0x58   : > { %1217 = vmatprep.mubr.bf16.mxu0 %v1302_v20  ;;  %v1324_v20 = vld [vmem:[%s1569_s7 + $0x64] ss:$8 sps:$4 sm:$0xff]  }
  0x5f   : > { %1218 = vmatmul.mubr.bf16.gmra.mrb[24].mxu0 %v1303_v21  ;;  %v1326_v21 = vld [vmem:[%s1569_s7 + $0x60] ss:$8 sps:$4 sm:$0xff]  }
  0x60   : > { %1221 = vmatprep.mubr.bf16.mxu0 %v1304_v22  ;;  %v1327_v22 = vld [vmem:[%s1569_s7 + $0x74] ss:$8 sps:$4 sm:$0xff]  }
  0x67   : > { %1222 = vmatmul.mubr.bf16.gmra.mrb[28].mxu0 %v1305_v23  ;;  %v1329_v23 = vld [vmem:[%s1569_s7 + $0x70] ss:$8 sps:$4 sm:$0xff]  }
 0x102   : > { %v1195_v25 = vpop.f32.mrb[0].mxu0 }
 0x103   : > { %v482_v26 = vpop.f32.mrb[1].mxu0 }
 0x104   : > { %v1196_v27 = vpop.f32.mrb[2].mxu0 }
 0x105   : > { %v642_v28 = vpack.c.bf16 %v1196_v27, %v1195_v25  ;;  %v485_v29 = vpop.f32.mrb[3].mxu0 }
 0x106   : > { %v641_v30 = vpack.c.bf16 %v485_v29, %v482_v26  ;;  %v1591_v26 = vld [vmem:[%s1689_s3] ss:$0 sm:$0xff] }
 0x10a   : > { %v1199_v31 = vpop.f32.mrb[4].mxu0 }
 0x10b   : > { %v498_v32 = vpop.f32.mrb[5].mxu0 }
 0x10c   : > { %v1200_v33 = vpop.f32.mrb[6].mxu0 }
 0x10d   : > { %v644_v34 = vpack.c.bf16 %v1200_v33, %v1199_v31  ;;  %v501_v35 = vpop.f32.mrb[7].mxu0 }
 0x10e   : > { %v643_v36 = vpack.c.bf16 %v501_v35, %v498_v32 }
 0x112   : > { %v1203_v37 = vpop.f32.mrb[8].mxu0 }
 0x113   : > { %v514_v38 = vpop.f32.mrb[9].mxu0 }
 0x114   : > { %v1204_v39 = vpop.f32.mrb[10].mxu0 }
 0x115   : > { %v646_v40 = vpack.c.bf16 %v1204_v39, %v1203_v37  ;;  %v517_v41 = vpop.f32.mrb[11].mxu0 }
 0x116   : > { %v645_v42 = vpack.c.bf16 %v517_v41, %v514_v38 }
 0x11a   : > { %v1207_v43 = vpop.f32.mrb[12].mxu0 }
 0x11b   : > { %v530_v44 = vpop.f32.mrb[13].mxu0 }
 0x11c   : > { %v1208_v45 = vpop.f32.mrb[14].mxu0 }
 0x11d   : > { %v648_v46 = vpack.c.bf16 %v1208_v45, %v1207_v43  ;;  %v533_v47 = vpop.f32.mrb[15].mxu0 }
 0x11e   : > { %v647_v48 = vpack.c.bf16 %v533_v47, %v530_v44 }
 0x122   : > { %v1211_v49 = vpop.f32.mrb[16].mxu0 }
 0x123   : > { %v546_v50 = vpop.f32.mrb[17].mxu0 }
 0x124   : > { %v1212_v51 = vpop.f32.mrb[18].mxu0 }
 0x125   : > { %v650_v52 = vpack.c.bf16 %v1212_v51, %v1211_v49  ;;  %v549_v53 = vpop.f32.mrb[19].mxu0 }
 0x126   : > { %v649_v54 = vpack.c.bf16 %v549_v53, %v546_v50 }
 0x128   : > { %1113 = vmatprep.subr.bf16.mxu1 %v649_v54 }
 0x129   : > { %1114 = vmatpush3.bf16.msra.mxu1 %v641_v30 }
 0x12a   : > { %v1215_v55 = vpop.f32.mrb[20].mxu0  ;;  %1115 = vmatprep.subr.bf16.mxu1 %v650_v52 }
 0x12b   : > { %v562_v56 = vpop.f32.mrb[21].mxu0 }
 0x12c   : > { %v1216_v57 = vpop.f32.mrb[22].mxu0 }
 0x12d   : > { %v652_v58 = vpack.c.bf16 %v1216_v57, %v1215_v55  ;;  %v565_v59 = vpop.f32.mrb[23].mxu0  ;;  %1116 = vmatpush3.bf16.msra.mxu1 %v642_v28 }
 0x12e   : > { %v651_v60 = vpack.c.bf16 %v565_v59, %v562_v56 }
 0x130   : > { %1117 = vmatprep.subr.bf16.mxu1 %v651_v60 }
 0x131   : > { %1118 = vmatpush3.bf16.msra.mxu1 %v643_v36 }
 0x132   : > { %v1219_v61 = vpop.f32.mrb[24].mxu0  ;;  %1119 = vmatprep.subr.bf16.mxu1 %v652_v58 }
 0x133   : > { %v578_v62 = vpop.f32.mrb[25].mxu0 }
 0x134   : > { %v1220_v63 = vpop.f32.mrb[26].mxu0 }
 0x135   : > { %v654_v0 = vpack.c.bf16 %v1220_v63, %v1219_v61  ;;  %v581_v1 = vpop.f32.mrb[27].mxu0  ;;  %1120 = vmatpush3.bf16.msra.mxu1 %v644_v34 }
 0x136   : > { %v653_v2 = vpack.c.bf16 %v581_v1, %v578_v62 }
 0x138   : > { %1121 = vmatprep.subr.bf16.mxu1 %v653_v2 }
 0x139   : > { %1122 = vmatpush3.bf16.msra.mxu1 %v645_v42 }
 0x13a   : > { %v1223_v3 = vpop.f32.mrb[28].mxu0  ;;  %1123 = vmatprep.subr.bf16.mxu1 %v654_v0 }
 0x13b   : > { %v594_v4 = vpop.f32.mrb[29].mxu0 }
 0x13c   : > { %v1224_v5 = vpop.f32.mrb[30].mxu0 }
 0x13d   : > { %v656_v6 = vpack.c.bf16 %v1224_v5, %v1223_v3  ;;  %v597_v7 = vpop.f32.mrb[31].mxu0  ;;  %1124 = vmatpush3.bf16.msra.mxu1 %v646_v40 }
 0x13e   : > { %v655_v8 = vpack.c.bf16 %v597_v7, %v594_v4 }
 0x140   : > { %1125 = vmatprep.subr.bf16.mxu1 %v655_v8 }
 0x141   : > { %1126 = vmatpush3.bf16.msra.mxu1 %v647_v48 }
 0x142   : > { %1127 = vmatprep.subr.bf16.mxu1 %v656_v6 }
 0x145   : > { %1128 = vmatpush3.bf16.msra.mxu1 %v648_v46 }
 0x148   : > { %770 = vmatmul.mubr.bf16.vlgmr.msra.gmra.mrb[0].mxu1 %v1306_v9 }
 0x149   : > { %777 = vmatprep.mubr.bf16.mxu1 %v1309_v10 }
 0x150   : > { %778 = vmatmul.mubr.bf16.gmra.mrb[4].mxu1 %v1311_v11 }
 0x151   : > { %785 = vmatprep.mubr.bf16.mxu1 %v1312_v12 }
 0x158   : > { %786 = vmatmul.mubr.bf16.gmra.mrb[8].mxu1 %v1314_v13 }
 0x159   : > { %793 = vmatprep.mubr.bf16.mxu1 %v1315_v14 }
 0x160   : > { %794 = vmatmul.mubr.bf16.gmra.mrb[12].mxu1 %v1317_v15 }
 0x161   : > { %801 = vmatprep.mubr.bf16.mxu1 %v1318_v16 }
 0x168   : > { %802 = vmatmul.mubr.bf16.gmra.mrb[16].mxu1 %v1320_v17 }
 0x169   : > { %809 = vmatprep.mubr.bf16.mxu1 %v1321_v18 }
 0x170   : > { %810 = vmatmul.mubr.bf16.gmra.mrb[20].mxu1 %v1323_v19 }
 0x171   : > { %817 = vmatprep.mubr.bf16.mxu1 %v1324_v20 }
 0x178   : > { %818 = vmatmul.mubr.bf16.gmra.mrb[24].mxu1 %v1326_v21 }
 0x179   : > { %825 = vmatprep.mubr.bf16.mxu1 %v1327_v22 }
 0x180   : > { %826 = vmatmul.mubr.bf16.gmra.mrb[28].mxu1 %v1329_v23 }
 0x21b   : > { %v1129_v24 = vpop.f32.mrb[0].mxu1 }
 0x21c   : > { %v1130_v25 = vpop.f32.mrb[1].mxu1 }
 0x21d   : > { %v1131_v27 = vadd.f32 %v1130_v25, %v1129_v24  ;;  %v1132_v28 = vpop.f32.mrb[2].mxu1 }
 0x21e   : > { %v1133_v29 = vpop.f32.mrb[3].mxu1 }
 0x21f   : > { %v892_v30 = vadd.f32 %v1131_v27, %v1591_v26  ;;  %v1134_v31 = vadd.f32 %v1133_v29, %v1132_v28 }
 0x221   : > { %v908_v32 = vmax.f32 %v892_v30, 0.0  ;;  %v893_v33 = vadd.f32 %v1134_v31, %v1591_v26 }
 0x223   : > { %924 = vst [vmem:[%s1597_s12] sm:$0xff] %v908_v32  ;;  %v909_v34 = vmax.f32 %v893_v33, 0.0  ;;  %v1135_v35 = vpop.f32.mrb[4].mxu1 }
 0x224   : > { %v1136_v36 = vpop.f32.mrb[5].mxu1 }
 0x225   : > { %925 = vst [vmem:[%s1597_s12 + $0x8] sm:$0xff] %v909_v34  ;;  %v1137_v37 = vadd.f32 %v1136_v36, %v1135_v35  ;;  %v1138_v38 = vpop.f32.mrb[6].mxu1 }
 0x226   : > { %v1139_v39 = vpop.f32.mrb[7].mxu1 }
 0x227   : > { %v894_v40 = vadd.f32 %v1137_v37, %v1591_v26  ;;  %v1140_v41 = vadd.f32 %v1139_v39, %v1138_v38 }
 0x229   : > { %v910_v42 = vmax.f32 %v894_v40, 0.0  ;;  %v895_v43 = vadd.f32 %v1140_v41, %v1591_v26 }
 0x22b   : > { %926 = vst [vmem:[%s1597_s12 + $0x10] sm:$0xff] %v910_v42  ;;  %v911_v44 = vmax.f32 %v895_v43, 0.0  ;;  %v1141_v45 = vpop.f32.mrb[8].mxu1 }
 0x22c   : > { %v1142_v46 = vpop.f32.mrb[9].mxu1 }
 0x22d   : > { %927 = vst [vmem:[%s1597_s12 + $0x18] sm:$0xff] %v911_v44  ;;  %v1143_v47 = vadd.f32 %v1142_v46, %v1141_v45  ;;  %v1144_v48 = vpop.f32.mrb[10].mxu1 }
 0x22e   : > { %v1145_v49 = vpop.f32.mrb[11].mxu1 }
 0x22f   : > { %v896_v50 = vadd.f32 %v1143_v47, %v1591_v26  ;;  %v1146_v51 = vadd.f32 %v1145_v49, %v1144_v48 }
 0x231   : > { %v912_v52 = vmax.f32 %v896_v50, 0.0  ;;  %v897_v53 = vadd.f32 %v1146_v51, %v1591_v26 }
 0x233   : > { %928 = vst [vmem:[%s1597_s12 + $0x20] sm:$0xff] %v912_v52  ;;  %v913_v54 = vmax.f32 %v897_v53, 0.0  ;;  %v1147_v55 = vpop.f32.mrb[12].mxu1 }
 0x234   : > { %v1148_v56 = vpop.f32.mrb[13].mxu1 }
 0x235   : > { %929 = vst [vmem:[%s1597_s12 + $0x28] sm:$0xff] %v913_v54  ;;  %v1149_v57 = vadd.f32 %v1148_v56, %v1147_v55  ;;  %v1150_v58 = vpop.f32.mrb[14].mxu1 }
 0x236   : > { %v1151_v59 = vpop.f32.mrb[15].mxu1 }
 0x237   : > { %v898_v60 = vadd.f32 %v1149_v57, %v1591_v26  ;;  %v1152_v61 = vadd.f32 %v1151_v59, %v1150_v58 }
 0x239   : > { %v914_v62 = vmax.f32 %v898_v60, 0.0  ;;  %v899_v63 = vadd.f32 %v1152_v61, %v1591_v26 }
 0x23b   : > { %930 = vst [vmem:[%s1597_s12 + $0x30] sm:$0xff] %v914_v62  ;;  %v915_v0 = vmax.f32 %v899_v63, 0.0  ;;  %v1153_v1 = vpop.f32.mrb[16].mxu1 }
 0x23c   : > { %v1154_v2 = vpop.f32.mrb[17].mxu1 }
 0x23d   : > { %931 = vst [vmem:[%s1597_s12 + $0x38] sm:$0xff] %v915_v0  ;;  %v1155_v3 = vadd.f32 %v1154_v2, %v1153_v1  ;;  %v1156_v4 = vpop.f32.mrb[18].mxu1 }
 0x23e   : > { %v1157_v5 = vpop.f32.mrb[19].mxu1 }
 0x23f   : > { %v900_v6 = vadd.f32 %v1155_v3, %v1591_v26  ;;  %v1158_v7 = vadd.f32 %v1157_v5, %v1156_v4 }
 0x241   : > { %v916_v8 = vmax.f32 %v900_v6, 0.0  ;;  %v901_v9 = vadd.f32 %v1158_v7, %v1591_v26 }
 0x243   : > { %932 = vst [vmem:[%s1597_s12 + $0x40] sm:$0xff] %v916_v8  ;;  %v917_v10 = vmax.f32 %v901_v9, 0.0  ;;  %v1159_v11 = vpop.f32.mrb[20].mxu1 }
 0x244   : > { %v1160_v12 = vpop.f32.mrb[21].mxu1 }
 0x245   : > { %933 = vst [vmem:[%s1597_s12 + $0x48] sm:$0xff] %v917_v10  ;;  %v1161_v13 = vadd.f32 %v1160_v12, %v1159_v11  ;;  %v1162_v14 = vpop.f32.mrb[22].mxu1 }
 0x246   : > { %v1163_v15 = vpop.f32.mrb[23].mxu1 }
 0x247   : > { %v902_v16 = vadd.f32 %v1161_v13, %v1591_v26  ;;  %v1164_v17 = vadd.f32 %v1163_v15, %v1162_v14 }
 0x249   : > { %v918_v18 = vmax.f32 %v902_v16, 0.0  ;;  %v903_v19 = vadd.f32 %v1164_v17, %v1591_v26 }
 0x24b   : > { %934 = vst [vmem:[%s1597_s12 + $0x50] sm:$0xff] %v918_v18  ;;  %v919_v20 = vmax.f32 %v903_v19, 0.0  ;;  %v1165_v21 = vpop.f32.mrb[24].mxu1 }
 0x24c   : > { %v1166_v22 = vpop.f32.mrb[25].mxu1 }
 0x24d   : > { %935 = vst [vmem:[%s1597_s12 + $0x58] sm:$0xff] %v919_v20  ;;  %v1167_v23 = vadd.f32 %v1166_v22, %v1165_v21  ;;  %v1168_v24 = vpop.f32.mrb[26].mxu1 }
 0x24e   : > { %v1169_v25 = vpop.f32.mrb[27].mxu1 }
 0x24f   : > { %v904_v27 = vadd.f32 %v1167_v23, %v1591_v26  ;;  %v1170_v28 = vadd.f32 %v1169_v25, %v1168_v24 }
 0x251   : > { %v920_v29 = vmax.f32 %v904_v27, 0.0  ;;  %v905_v30 = vadd.f32 %v1170_v28, %v1591_v26 }
 0x253   : > { %936 = vst [vmem:[%s1597_s12 + $0x60] sm:$0xff] %v920_v29  ;;  %v921_v31 = vmax.f32 %v905_v30, 0.0  ;;  %v1171_v32 = vpop.f32.mrb[28].mxu1 }
 0x254   : > { %v1172_v33 = vpop.f32.mrb[29].mxu1 }
 0x255   : > { %937 = vst [vmem:[%s1597_s12 + $0x68] sm:$0xff] %v921_v31  ;;  %v1173_v34 = vadd.f32 %v1172_v33, %v1171_v32  ;;  %v1174_v35 = vpop.f32.mrb[30].mxu1 }
 0x256   : > { %v1175_v36 = vpop.f32.mrb[31].mxu1 }
 0x257   : > { %v906_v37 = vadd.f32 %v1173_v34, %v1591_v26  ;;  %v1176_v38 = vadd.f32 %v1175_v36, %v1174_v35 }
 0x259   : > { %v922_v39 = vmax.f32 %v906_v37, 0.0  ;;  %v907_v40 = vadd.f32 %v1176_v38, %v1591_v26 }
 0x25b   : > { %938 = vst [vmem:[%s1597_s12 + $0x70] sm:$0xff] %v922_v39  ;;  %v923_v41 = vmax.f32 %v907_v40, 0.0 }
 0x25d   : > { %939 = vst [vmem:[%s1597_s12 + $0x78] sm:$0xff] %v923_v41 }
 0x25e   : > { %1343 = shalt.err (!%p1340_p5)
}
 0x25f   : > { %s1344_s6 = scalar_lea.hbm %s1632_s24, 2048  ;;  %s1348_s9 = scalar_lea.hbm %s1690_s4, 4096 }
 0x260   : > { %p1345_p6 = scmp.ne.s32.totalorder %s1632_s24, %s1344_s6  ;;  %p1349_p10 = scmp.lt.u32.totalorder %s1632_s24, %s1690_s4 }
 0x261   : > { %p1350_p11 = scmp.lt.u32.totalorder %s1348_s9, %s1344_s6  ;;  %p1352_p13 = scmp.lt.u32.totalorder %s1344_s6, %s1632_s24 }
 0x262   : > { %p1346_p7 = pnand %p1345_p6, %p1478_p4 }
 0x263   : > { %p1351_p12 = por %p1350_p11, %p1349_p10 }
 0x264   : > { %p1347_p9 = pneg %p1346_p7 }
 0x265   : > { %p1353_p0 = por %p1352_p13, %p1351_p12 }
 0x267   : > { %p1354_p1 = pnand %p1353_p0, %p1347_p9 }
 0x269   : > { %1357 = shalt.err (!%p1354_p1)
}
 0x26a   : > { %s1411_s12 = smov 128   ;;  %s1412_s13 = smov 8  }
 0x26b   : > { %1225 = dma.vmem_to_hbm [thread:$0]  (%p1478_p4), %s1634_s14, 2048, %s1632_s24, %s1640_s26, %s1411_s12, %s1411_s12, %s1412_s13  }
 0x26c PF: > { %p1231_p2 = scmp.ge.s32.totalorder %s1408_s20, 2  ;;  %s969_s21 = sand.u32 1, %s1388_s15  }
 0x26d   : > { %s970_s22 = scalar_lea.sflag [#allocation4], %s969_s21 }
 0x26e   : > { %p1228_p3 = pnand %p1231_p2, %p1485_p8 }
 0x270   : > { %1383 = dma.done.wait (!%p1228_p3), %s970_s22, 2048  }
 0x271   : > { %1385 = vsyncadd (!%p1228_p3), %s970_s22, 4294965248  ;;  %s17_s20 = sadd.s32 1, %s1408_s20   ;;  %s1693_s15 = smov %s1392_s16 }
 0x272   : > { %p14_p5 = scmp.ge.s32.totalorder %s17_s20, 4   ;;  %s1694_s16 = smov %s1396_s17 }
 0x273   : > { %s1695_s17 = smov %s1491_s28  ;;  %s1696_s18 = smov %s1404_s19 }
 0x274   : > { %s1697_s19 = smov %s1699_s23  ;;  %16 = sbr.rel (!%p14_p5) target bundleno = 4 (0x4), region = 80 }
 0x27b   :  { %975 = vsyncpa [#allocation4], 1 }
 0x27c   :  { %977 = vsyncpa [#allocation4 + $0x1], 1 }

// kernel: encoder_forward.2
= control target key start
LH: loop header
LB: loop body
LE: loop exit
PB: predicated region body
PF: predicated region fallthrough
CT: control target
= control target key end

     0   :  { %9 = vsyncpa [#allocation4], 0  ;;  %s1960_s0 = inlined_call_operand.hbm [shape: bf16[256,256], index: 0, kind: input, shape index: {}]   ;;  %s1961_s1 = inlined_call_operand.hbm [shape: bf16[256,128], index: 1, kind: input, shape index: {}]   ;;  %s1962_s2 = inlined_call_operand.hbm [shape: bf16[128,128], index: 2, kind: input, shape index: {}]   ;;  %s1963_s3 = inlined_call_operand.vmem [shape: f32[1,128], index: 3, kind: input, shape index: {}]   ;;  %s1964_s4 = inlined_call_operand.vmem [shape: bf16[256,128], index: 4, kind: output, shape index: {}]  }
   0x1   :  { %11 = vsyncpa [#allocation4 + $0x1], 0 }
   0x2   :  { %12 = vsyncpa [#allocation6], 0  ;;  %s1719_s15 = smov 0   ;;  %s1721_s16 = smov 0  }
   0x3   :  { %s1723_s17 = smov 0   ;;  %s1725_s18 = smov 0  }
   0x4   :  { %s1727_s19 = smov 0   ;;  %s1729_s20 = smov 0  }
   0x5 LB: > { %s1141_s21 = sadd.s32 4294967295, %s1685_s20   ;;  %p52_p0 = scmp.ne.s32.totalorder %s1669_s16, %s1665_s15  ;;  %s1685_s20 = sphi %s1729_s20, %s18_s20   ;;  %s1681_s19 = sphi %s1727_s19, %s1981_s19   ;;  %s1677_s18 = sphi %s1725_s18, %s1980_s18   ;;  %s1673_s17 = sphi %s1723_s17, %s1979_s17   ;;  %s1669_s16 = sphi %s1721_s16, %s1978_s16   ;;  %s1665_s15 = sphi %s1719_s15, %s1977_s15  }
   0x6   : > { %p1749_p1 = scmp.eq.s32.totalorder %s1141_s21, 0  ;;  %p1143_p2 = scmp.ge.s32.totalorder %s1685_s20, 1 }
   0x7   : > { %p152_p3 = scmp.lt.s32.totalorder %s1685_s20, 3  ;;  %s1687_s25 = smov [#allocation5]  }
   0x8   : > { %s1969_s22 = scalar_select %p1749_p1, 1, 0 }
   0x9   : > { %p1757_p4 = por %p1749_p1, %p52_p0  ;;  %p1761_p5 = pnand %p1143_p2, %p152_p3 }
   0xa   : > { %s164_s26 = sshll.u32 %s1687_s25, 4  ;;  %s1688_s28 = smov [#allocation7]   ;;  %s165_s26 = int_to_ptr.vmem [resolvable:$true] %s164_s26 }
   0xb   : > { %s1970_s23 = scalar_select %p1757_p4, 1, 0 }
   0xc   : > { %s1971_s24 = scalar_select %p1761_p5, 1, 0 }
   0xd   : > { %p1427_p6 = pneg %p1761_p5  ;;  %s177_s29 = sshll.u32 %s1688_s28, 4  ;;  %s1773_s29 = int_to_ptr.vmem [resolvable:$true] %s177_s29 }
   0xe   : > { %s1545_s6 = scalar_lea.hbm %s1961_s1, 2048 }
   0xf   : > { %p1769_p7 = pnand %p1427_p6, %p1749_p1  ;;  %p1546_p8 = scmp.ne.s32.totalorder %s1961_s1, %s1545_s6 }
  0x10   : > { %p1552_p12 = scmp.lt.u32.totalorder %s1545_s6, %s1961_s1 }
  0x11   : > { %p1547_p9 = pneg %p1769_p7 }
  0x13   : > { %p1548_p10 = pnand %p1547_p9, %p1546_p8 }
  0x15   : > { %p1549_p11 = pneg %p1548_p10 }
  0x17   : > { %p1554_p13 = pnand %p1552_p12, %p1549_p11 }
  0x19   : > { %1557 = shalt.err (!%p1554_p13)
}
  0x1a   : > { %s1558_s11 = scalar_lea.vmem %s165_s26, 2048  ;;  %p1566_p6 = scmp.lt.s32.totalorder %s165_s26, %s165_s26 }
  0x1b   : > { %p1559_p0 = scmp.ne.s32.totalorder %s165_s26, %s1558_s11  ;;  %p1567_p1 = scmp.lt.s32.totalorder %s1558_s11, %s1558_s11 }
  0x1d   : > { %p1561_p2 = pnand %p1559_p0, %p1547_p9  ;;  %p1568_p4 = por %p1567_p1, %p1566_p6 }
  0x1f   : > { %p1562_p3 = pneg %p1561_p2 }
  0x21   : > { %p1569_p5 = pnand %p1568_p4, %p1562_p3 }
  0x23   : > { %1572 = shalt.err (!%p1569_p5)
}
  0x24   : > { %s1689_s12 = smov 64   ;;  %s1690_s13 = smov 4  }
  0x25   : > { %1430 = dma.hbm_to_vmem [thread:$0]  (!%p1769_p7), %s1961_s1, 2048, %s165_s26, [#allocation6], %s1689_s12, %s1689_s12, %s1690_s13  }
  0x26   : > { %s1573_s28 = scalar_lea.hbm %s1962_s2, 1024 }
  0x27   : > { %p1574_p8 = scmp.ne.s32.totalorder %s1962_s2, %s1573_s28  ;;  %p1580_p5 = scmp.lt.u32.totalorder %s1573_s28, %s1962_s2 }
  0x29   : > { %p1576_p1 = pnand %p1574_p8, %p1547_p9 }
  0x2b   : > { %p1577_p4 = pneg %p1576_p1 }
  0x2d   : > { %p1582_p10 = pnand %p1580_p5, %p1577_p4 }
  0x2f   : > { %1585 = shalt.err (!%p1582_p10)
}
  0x30   : > { %s1586_s26 = scalar_lea.vmem %s1773_s29, 1024  ;;  %p1594_p0 = scmp.lt.s32.totalorder %s1773_s29, %s1773_s29 }
  0x31   : > { %p1587_p11 = scmp.ne.s32.totalorder %s1773_s29, %s1586_s26  ;;  %p1595_p2 = scmp.lt.s32.totalorder %s1586_s26, %s1586_s26 }
  0x33   : > { %p1589_p12 = pnand %p1587_p11, %p1547_p9  ;;  %p1596_p3 = por %p1595_p2, %p1594_p0 }
  0x35   : > { %p1590_p13 = pneg %p1589_p12 }
  0x37   : > { %p1597_p6 = pnand %p1596_p3, %p1590_p13 }
  0x39   : > { %1600 = shalt.err (!%p1597_p6)
}
  0x3a   : > { %1433 = dma.hbm_to_vmem [thread:$0]  (!%p1769_p7), %s1962_s2, 1024, %s1773_s29, [#allocation6], %s1689_s12, %s1689_s12, %s1690_s13  }
  0x3b   : > { %s30_s10 = sadd.s32 1, %s1681_s19  ;;  %s39_s11 = sadd.s32 1, %s1673_s17 }
  0x3c   : > { %p32_p9 = scmp.ge.s32.totalorder %s30_s10, 2  ;;  %p46_p8 = scmp.ne.s32.totalorder %s1673_s17, %s1669_s16 }
  0x3d   : > { %p47_p1 = scmp.eq.s32.totalorder %s1685_s20, 0  ;;  %p1440_p4 = scmp.lt.s32.totalorder %s1685_s20, 2 }
  0x3e   : > { %s1983_s10 = smov (%p32_p9, %s30_s10), 0  ;;  %s194_s27 = sand.u32 1, %s1673_s17  }
  0x3f   : > { %p48_p5 = por %p47_p1, %p46_p8  ;;  %s34_s14 = ssub.s32 %s1681_s19, %s1983_s10 }
  0x40   : > { %p37_p10 = scmp.eq.s32.totalorder %s34_s14, 0  ;;  %s1147_s15 = sshll.u32 %s194_s27, 7 }
  0x41   : > { %s1217_s21 = sshll.u32 %s1681_s19, 11  ;;  %s198_s13 = scalar_lea.vmem [#allocation3], %s1147_s15 }
  0x42   : > { %s1835_s25 = scalar_select %p37_p10, %s1673_s17, %s39_s11  }
  0x43   : > { %s1840_s12 = scalar_lea.hbm %s1960_s0, %s1217_s21  ;;  %s208_s30 = sshll.u32 %s198_s13, 4  ;;  %s1842_s30 = int_to_ptr.vmem [resolvable:$true] %s208_s30 }
  0x44   : > { %p1846_p7 = pnand %p1440_p4, %p48_p5  ;;  %s1850_s6 = scalar_lea.sflag [#allocation4], %s194_s27 }
  0x45   : > { %s1601_s7 = scalar_lea.hbm %s1840_s12, 2048  ;;  %s1606_s9 = scalar_lea.hbm %s1960_s0, 4096 }
  0x46   : > { %p1602_p11 = scmp.ne.s32.totalorder %s1840_s12, %s1601_s7  ;;  %p1603_p12 = pneg %p1846_p7 }
  0x47   : > { %p1607_p2 = scmp.lt.u32.totalorder %s1840_s12, %s1960_s0  ;;  %p1608_p3 = scmp.lt.u32.totalorder %s1606_s9, %s1601_s7 }
  0x48   : > { %p1604_p13 = pnand %p1603_p12, %p1602_p11  ;;  %p1610_p9 = scmp.lt.u32.totalorder %s1601_s7, %s1840_s12 }
  0x49   : > { %p1609_p6 = por %p1608_p3, %p1607_p2 }
  0x4a   : > { %p1605_p0 = pneg %p1604_p13 }
  0x4b   : > { %p1611_p8 = por %p1610_p9, %p1609_p6 }
  0x4d   : > { %p1612_p1 = pnand %p1611_p8, %p1605_p0 }
  0x4f   : > { %1615 = shalt.err (!%p1612_p1)
}
  0x50   : > { %s1616_s27 = scalar_lea.vmem %s1842_s30, 2048  ;;  %s1691_s15 = smov [#allocation3]  }
  0x51   : > { %p1617_p4 = scmp.ne.s32.totalorder %s1842_s30, %s1616_s27  ;;  %s1621_s21 = sshll.u32 %s1691_s15, 4  ;;  %s1622_s21 = int_to_ptr.vmem [resolvable:$false] %s1621_s21 }
  0x52   : > { %s1623_s28 = scalar_lea.vmem %s1622_s21, 4096  ;;  %p1624_p11 = scmp.lt.s32.totalorder %s1842_s30, %s1622_s21 }
  0x53   : > { %p1619_p5 = pnand %p1617_p4, %p1603_p12  ;;  %p1625_p13 = scmp.lt.s32.totalorder %s1623_s28, %s1616_s27 }
  0x55   : > { %p1620_p10 = pneg %p1619_p5  ;;  %p1626_p2 = por %p1625_p13, %p1624_p11 }
  0x57   : > { %p1627_p3 = pnand %p1626_p2, %p1620_p10 }
  0x59   : > { %1630 = shalt.err (!%p1627_p3)
}
  0x5a   : > { %s1692_s29 = smov 128   ;;  %s1693_s13 = smov 8  }
  0x5b   : > { %1437 = dma.hbm_to_vmem [thread:$0]  (!%p1846_p7), %s1840_s12, 2048, %s1842_s30, %s1850_s6, %s1692_s29, %s1692_s29, %s1693_s13  }
  0x5c   : > { %p1974_p12 = scmp.ne.s32.totalorder %s1971_s24, 0 }
  0x5d   : > { %s222_s7 = sand.u32 (!%p1974_p12), 1, %s1669_s16   ;;  %p1975_p0 = scmp.ne.s32.totalorder (!%p1974_p12), %s1970_s23, 0 }
  0x5e   : > { %220 = sbr.rel (%p1974_p12) target bundleno = 699 (0x2bb), region = 36  ;;  %s1152_s26 = sshll.u32 (!%p1974_p12), %s222_s7, 7 }
  0x5f   : > { %s223_s8 = scalar_lea.sflag (!%p1974_p12), [#allocation4], %s222_s7  ;;  %s1881_s9 = scalar_lea.vmem (!%p1974_p12), [#allocation3], %s1152_s26 }
  0x65   : > { %1656 = dma.done.wait (%p1975_p0), %s223_s8, 2048  }
  0x66   : > { %1658 = vsyncadd (%p1975_p0), %s223_s8, 4294965248  ;;  %p1976_p6 = scmp.ne.s32.totalorder %s1969_s22, 0 }
  0x68   : > { %1660 = dma.done.wait (%p1976_p6), [#allocation6], 3072  }
  0x69   : > { %1662 = vsyncadd (%p1976_p6), [#allocation6], 4294964224  ;;  %v1497_v0 = vld [vmem:[#allocation7] sm:$0xff]   ;;  %v1498_v1 = vld [vmem:[#allocation7 + $0x8] sm:$0xff]   ;;  %s1155_s22 = sshll.u32 %s1677_s18, 4 }
  0x6a   : > { %1369 = vmatprep.subr.bf16.mxu0 %v1497_v0  ;;  %v1499_v2 = vld [vmem:[#allocation7 + $0x10] sm:$0xff]   ;;  %v1500_v3 = vld [vmem:[#allocation7 + $0x18] sm:$0xff]   ;;  %v1505_v4 = vld [vmem:[#allocation5] sm:$0xff]   ;;  %p262_p7 = scmp.lt.s32.totalorder %s1155_s22, 31 }
  0x6b   : > { %1370 = vmatpush3.bf16.msra.mxu0 %v1497_v0  ;;  %1385 = vmatprep.mubr.bf16.mxu0 %v1505_v4  ;;  %v1501_v5 = vld [vmem:[#allocation7 + $0x20] sm:$0xff]   ;;  %v1502_v6 = vld [vmem:[#allocation7 + $0x28] sm:$0xff]   ;;  %v1503_v7 = vld [vmem:[#allocation7 + $0x30] sm:$0xff]  }
  0x6c   : > { %1371 = vmatprep.subr.bf16.mxu0 %v1498_v1  ;;  %v1504_v8 = vld [vmem:[#allocation7 + $0x38] sm:$0xff]   ;;  %v1506_v9 = vld [vmem:[#allocation5 + $0x8] sm:$0xff]   ;;  %v1507_v10 = vld [vmem:[#allocation5 + $0x10] sm:$0xff]   ;;  %s1985_s22 = smov (!%p262_p7, %s1155_s22), 31 }
  0x6d   : > { %v1508_v11 = vld [vmem:[#allocation5 + $0x18] sm:$0xff]   ;;  %v1509_v12 = vld [vmem:[#allocation5 + $0x20] sm:$0xff]   ;;  %v1510_v13 = vld [vmem:[#allocation5 + $0x28] sm:$0xff]   ;;  %s1156_s12 = sshll.u32 %s1985_s22, 2 }
  0x6e   : > { %v1511_v14 = vld [vmem:[#allocation5 + $0x30] sm:$0xff]   ;;  %v1512_v15 = vld [vmem:[#allocation5 + $0x38] sm:$0xff]   ;;  %v1513_v16 = vld [vmem:[#allocation5 + $0x40] sm:$0xff]   ;;  %s1918_s5 = scalar_lea.vmem %s1964_s4, %s1156_s12 }
  0x6f   : > { %1372 = vmatpush3.bf16.msra.mxu0 %v1498_v1  ;;  %v1514_v17 = vld [vmem:[#allocation5 + $0x48] sm:$0xff]   ;;  %v1515_v18 = vld [vmem:[#allocation5 + $0x50] sm:$0xff]   ;;  %v1516_v19 = vld [vmem:[#allocation5 + $0x58] sm:$0xff]  }
  0x70   : > { %1373 = vmatprep.subr.bf16.mxu0 %v1499_v2  ;;  %v1517_v20 = vld [vmem:[#allocation5 + $0x60] sm:$0xff]   ;;  %v1518_v21 = vld [vmem:[#allocation5 + $0x68] sm:$0xff]   ;;  %v1519_v22 = vld [vmem:[#allocation5 + $0x70] sm:$0xff]  }
  0x71   : > { %v1520_v23 = vld [vmem:[#allocation5 + $0x78] sm:$0xff]   ;;  %v1523_v24 = vld [vmem:[%s1881_s9 + $0x4] ss:$8 sps:$4 sm:$0xff]  }
  0x72   : > { %806 = vmatprep.mubr.bf16.mxu1 %v1523_v24 }
  0x73   : > { %1374 = vmatpush3.bf16.msra.mxu0 %v1499_v2 }
  0x74   : > { %1375 = vmatprep.subr.bf16.mxu0 %v1500_v3 }
  0x77   : > { %1376 = vmatpush3.bf16.msra.mxu0 %v1500_v3 }
  0x78   : > { %1377 = vmatprep.subr.bf16.mxu0 %v1501_v5 }
  0x7b   : > { %1378 = vmatpush3.bf16.msra.mxu0 %v1501_v5 }
  0x7c   : > { %1379 = vmatprep.subr.bf16.mxu0 %v1502_v6 }
  0x7f   : > { %1380 = vmatpush3.bf16.msra.mxu0 %v1502_v6 }
  0x80   : > { %1381 = vmatprep.subr.bf16.mxu0 %v1503_v7 }
  0x83   : > { %1382 = vmatpush3.bf16.msra.mxu0 %v1503_v7 }
  0x84   : > { %1383 = vmatprep.subr.bf16.mxu0 %v1504_v8 }
  0x87   : > { %1384 = vmatpush3.bf16.msra.mxu0 %v1504_v8 }
  0x8a   : > { %1386 = vmatmul.mubr.bf16.vlgmr.msra.gmra.mrb[0].mxu0 %v1506_v9  ;;  %v1521_v9 = vld [vmem:[%s1881_s9] ss:$8 sps:$4 sm:$0xff]  }
  0x8b   : > { %1389 = vmatprep.mubr.bf16.mxu0 %v1507_v10  ;;  %v1524_v10 = vld [vmem:[%s1881_s9 + $0x14] ss:$8 sps:$4 sm:$0xff]  }
  0x92   : > { %1390 = vmatmul.mubr.bf16.gmra.mrb[4].mxu0 %v1508_v11  ;;  %v1526_v11 = vld [vmem:[%s1881_s9 + $0x10] ss:$8 sps:$4 sm:$0xff]  }
  0x93   : > { %1393 = vmatprep.mubr.bf16.mxu0 %v1509_v12  ;;  %v1527_v12 = vld [vmem:[%s1881_s9 + $0x24] ss:$8 sps:$4 sm:$0xff]  }
  0x9a   : > { %1394 = vmatmul.mubr.bf16.gmra.mrb[8].mxu0 %v1510_v13  ;;  %v1529_v13 = vld [vmem:[%s1881_s9 + $0x20] ss:$8 sps:$4 sm:$0xff]  }
  0x9b   : > { %1397 = vmatprep.mubr.bf16.mxu0 %v1511_v14  ;;  %v1530_v14 = vld [vmem:[%s1881_s9 + $0x34] ss:$8 sps:$4 sm:$0xff]  }
  0xa2   : > { %1398 = vmatmul.mubr.bf16.gmra.mrb[12].mxu0 %v1512_v15  ;;  %v1532_v15 = vld [vmem:[%s1881_s9 + $0x30] ss:$8 sps:$4 sm:$0xff]  }
  0xa3   : > { %1401 = vmatprep.mubr.bf16.mxu0 %v1513_v16  ;;  %v1533_v16 = vld [vmem:[%s1881_s9 + $0x44] ss:$8 sps:$4 sm:$0xff]  }
  0xaa   : > { %1402 = vmatmul.mubr.bf16.gmra.mrb[16].mxu0 %v1514_v17  ;;  %v1535_v17 = vld [vmem:[%s1881_s9 + $0x40] ss:$8 sps:$4 sm:$0xff]  }
  0xab   : > { %1405 = vmatprep.mubr.bf16.mxu0 %v1515_v18  ;;  %v1536_v18 = vld [vmem:[%s1881_s9 + $0x54] ss:$8 sps:$4 sm:$0xff]  }
  0xb2   : > { %1406 = vmatmul.mubr.bf16.gmra.mrb[20].mxu0 %v1516_v19  ;;  %v1538_v19 = vld [vmem:[%s1881_s9 + $0x50] ss:$8 sps:$4 sm:$0xff]  }
  0xb3   : > { %1409 = vmatprep.mubr.bf16.mxu0 %v1517_v20  ;;  %v1539_v20 = vld [vmem:[%s1881_s9 + $0x64] ss:$8 sps:$4 sm:$0xff]  }
  0xba   : > { %1410 = vmatmul.mubr.bf16.gmra.mrb[24].mxu0 %v1518_v21  ;;  %v1541_v21 = vld [vmem:[%s1881_s9 + $0x60] ss:$8 sps:$4 sm:$0xff]  }
  0xbb   : > { %1413 = vmatprep.mubr.bf16.mxu0 %v1519_v22  ;;  %v1542_v22 = vld [vmem:[%s1881_s9 + $0x74] ss:$8 sps:$4 sm:$0xff]  }
  0xc2   : > { %1414 = vmatmul.mubr.bf16.gmra.mrb[28].mxu0 %v1520_v23  ;;  %v1544_v23 = vld [vmem:[%s1881_s9 + $0x70] ss:$8 sps:$4 sm:$0xff]  }
 0x15d   : > { %v1387_v25 = vpop.f32.mrb[0].mxu0 }
 0x15e   : > { %v519_v26 = vpop.f32.mrb[1].mxu0 }
 0x15f   : > { %v1388_v27 = vpop.f32.mrb[2].mxu0 }
 0x160   : > { %v679_v28 = vpack.c.bf16 %v1388_v27, %v1387_v25  ;;  %v522_v29 = vpop.f32.mrb[3].mxu0 }
 0x161   : > { %v678_v30 = vpack.c.bf16 %v522_v29, %v519_v26  ;;  %v1911_v26 = vld [vmem:[%s1963_s3] ss:$0 sm:$0xff] }
 0x165   : > { %v1391_v31 = vpop.f32.mrb[4].mxu0 }
 0x166   : > { %v535_v32 = vpop.f32.mrb[5].mxu0 }
 0x167   : > { %v1392_v33 = vpop.f32.mrb[6].mxu0 }
 0x168   : > { %v681_v34 = vpack.c.bf16 %v1392_v33, %v1391_v31  ;;  %v538_v35 = vpop.f32.mrb[7].mxu0 }
 0x169   : > { %v680_v36 = vpack.c.bf16 %v538_v35, %v535_v32 }
 0x16d   : > { %v1395_v37 = vpop.f32.mrb[8].mxu0 }
 0x16e   : > { %v551_v38 = vpop.f32.mrb[9].mxu0 }
 0x16f   : > { %v1396_v39 = vpop.f32.mrb[10].mxu0 }
 0x170   : > { %v683_v40 = vpack.c.bf16 %v1396_v39, %v1395_v37  ;;  %v554_v41 = vpop.f32.mrb[11].mxu0 }
 0x171   : > { %v682_v42 = vpack.c.bf16 %v554_v41, %v551_v38 }
 0x175   : > { %v1399_v43 = vpop.f32.mrb[12].mxu0 }
 0x176   : > { %v567_v44 = vpop.f32.mrb[13].mxu0 }
 0x177   : > { %v1400_v45 = vpop.f32.mrb[14].mxu0 }
 0x178   : > { %v685_v46 = vpack.c.bf16 %v1400_v45, %v1399_v43  ;;  %v570_v47 = vpop.f32.mrb[15].mxu0 }
 0x179   : > { %v684_v48 = vpack.c.bf16 %v570_v47, %v567_v44 }
 0x17d   : > { %v1403_v49 = vpop.f32.mrb[16].mxu0 }
 0x17e   : > { %v583_v50 = vpop.f32.mrb[17].mxu0 }
 0x17f   : > { %v1404_v51 = vpop.f32.mrb[18].mxu0 }
 0x180   : > { %v687_v52 = vpack.c.bf16 %v1404_v51, %v1403_v49  ;;  %v586_v53 = vpop.f32.mrb[19].mxu0 }
 0x181   : > { %v686_v54 = vpack.c.bf16 %v586_v53, %v583_v50 }
 0x183   : > { %1305 = vmatprep.subr.bf16.mxu1 %v686_v54 }
 0x184   : > { %1306 = vmatpush3.bf16.msra.mxu1 %v678_v30 }
 0x185   : > { %v1407_v55 = vpop.f32.mrb[20].mxu0  ;;  %1307 = vmatprep.subr.bf16.mxu1 %v687_v52 }
 0x186   : > { %v599_v56 = vpop.f32.mrb[21].mxu0 }
 0x187   : > { %v1408_v57 = vpop.f32.mrb[22].mxu0 }
 0x188   : > { %v689_v58 = vpack.c.bf16 %v1408_v57, %v1407_v55  ;;  %v602_v59 = vpop.f32.mrb[23].mxu0  ;;  %1308 = vmatpush3.bf16.msra.mxu1 %v679_v28 }
 0x189   : > { %v688_v60 = vpack.c.bf16 %v602_v59, %v599_v56 }
 0x18b   : > { %1309 = vmatprep.subr.bf16.mxu1 %v688_v60 }
 0x18c   : > { %1310 = vmatpush3.bf16.msra.mxu1 %v680_v36 }
 0x18d   : > { %v1411_v61 = vpop.f32.mrb[24].mxu0  ;;  %1311 = vmatprep.subr.bf16.mxu1 %v689_v58 }
 0x18e   : > { %v615_v62 = vpop.f32.mrb[25].mxu0 }
 0x18f   : > { %v1412_v63 = vpop.f32.mrb[26].mxu0 }
 0x190   : > { %v691_v0 = vpack.c.bf16 %v1412_v63, %v1411_v61  ;;  %v618_v1 = vpop.f32.mrb[27].mxu0  ;;  %1312 = vmatpush3.bf16.msra.mxu1 %v681_v34 }
 0x191   : > { %v690_v2 = vpack.c.bf16 %v618_v1, %v615_v62 }
 0x193   : > { %1313 = vmatprep.subr.bf16.mxu1 %v690_v2 }
 0x194   : > { %1314 = vmatpush3.bf16.msra.mxu1 %v682_v42 }
 0x195   : > { %v1415_v3 = vpop.f32.mrb[28].mxu0  ;;  %1315 = vmatprep.subr.bf16.mxu1 %v691_v0 }
 0x196   : > { %v631_v4 = vpop.f32.mrb[29].mxu0 }
 0x197   : > { %v1416_v5 = vpop.f32.mrb[30].mxu0 }
 0x198   : > { %v693_v6 = vpack.c.bf16 %v1416_v5, %v1415_v3  ;;  %v634_v7 = vpop.f32.mrb[31].mxu0  ;;  %1316 = vmatpush3.bf16.msra.mxu1 %v683_v40 }
 0x199   : > { %v692_v8 = vpack.c.bf16 %v634_v7, %v631_v4 }
 0x19b   : > { %1317 = vmatprep.subr.bf16.mxu1 %v692_v8 }
 0x19c   : > { %1318 = vmatpush3.bf16.msra.mxu1 %v684_v48 }
 0x19d   : > { %1319 = vmatprep.subr.bf16.mxu1 %v693_v6 }
 0x1a0   : > { %1320 = vmatpush3.bf16.msra.mxu1 %v685_v46 }
 0x1a3   : > { %807 = vmatmul.mubr.bf16.vlgmr.msra.gmra.mrb[0].mxu1 %v1521_v9 }
 0x1a4   : > { %814 = vmatprep.mubr.bf16.mxu1 %v1524_v10 }
 0x1ab   : > { %815 = vmatmul.mubr.bf16.gmra.mrb[4].mxu1 %v1526_v11 }
 0x1ac   : > { %822 = vmatprep.mubr.bf16.mxu1 %v1527_v12 }
 0x1b3   : > { %823 = vmatmul.mubr.bf16.gmra.mrb[8].mxu1 %v1529_v13 }
 0x1b4   : > { %830 = vmatprep.mubr.bf16.mxu1 %v1530_v14 }
 0x1bb   : > { %831 = vmatmul.mubr.bf16.gmra.mrb[12].mxu1 %v1532_v15 }
 0x1bc   : > { %838 = vmatprep.mubr.bf16.mxu1 %v1533_v16 }
 0x1c3   : > { %839 = vmatmul.mubr.bf16.gmra.mrb[16].mxu1 %v1535_v17 }
 0x1c4   : > { %846 = vmatprep.mubr.bf16.mxu1 %v1536_v18 }
 0x1cb   : > { %847 = vmatmul.mubr.bf16.gmra.mrb[20].mxu1 %v1538_v19 }
 0x1cc   : > { %854 = vmatprep.mubr.bf16.mxu1 %v1539_v20 }
 0x1d3   : > { %855 = vmatmul.mubr.bf16.gmra.mrb[24].mxu1 %v1541_v21 }
 0x1d4   : > { %862 = vmatprep.mubr.bf16.mxu1 %v1542_v22 }
 0x1db   : > { %863 = vmatmul.mubr.bf16.gmra.mrb[28].mxu1 %v1544_v23 }
 0x276   : > { %v1321_v24 = vpop.f32.mrb[0].mxu1 }
 0x277   : > { %v1322_v25 = vpop.f32.mrb[1].mxu1 }
 0x278   : > { %v1323_v27 = vadd.f32 %v1322_v25, %v1321_v24  ;;  %v1324_v28 = vpop.f32.mrb[2].mxu1 }
 0x279   : > { %v1325_v29 = vpop.f32.mrb[3].mxu1 }
 0x27a   : > { %v929_v30 = vadd.f32 %v1323_v27, %v1911_v26  ;;  %v1326_v31 = vadd.f32 %v1325_v29, %v1324_v28 }
 0x27c   : > { %v930_v32 = vadd.f32 %v1326_v31, %v1911_v26  ;;  %v945_v33 = vmax.f32 %v929_v30, 0.0 }
 0x27e   : > { %v946_v34 = vmax.f32 %v930_v32, 0.0  ;;  %v1327_v35 = vpop.f32.mrb[4].mxu1 }
 0x27f   : > { %v1328_v36 = vpop.f32.mrb[5].mxu1 }
 0x280   : > { %v1237_v37 = vpack.c.bf16 %v946_v34, %v945_v33  ;;  %v1329_v38 = vadd.f32 %v1328_v36, %v1327_v35  ;;  %v1330_v39 = vpop.f32.mrb[6].mxu1 }
 0x281   : > { %v1331_v40 = vpop.f32.mrb[7].mxu1 }
 0x282   : > { %1238 = vst [vmem:[%s1918_s5] sm:$0xff] %v1237_v37   ;;  %v931_v41 = vadd.f32 %v1329_v38, %v1911_v26  ;;  %v1332_v42 = vadd.f32 %v1331_v40, %v1330_v39 }
 0x284   : > { %v932_v43 = vadd.f32 %v1332_v42, %v1911_v26  ;;  %v947_v44 = vmax.f32 %v931_v41, 0.0 }
 0x286   : > { %v948_v45 = vmax.f32 %v932_v43, 0.0  ;;  %v1333_v46 = vpop.f32.mrb[8].mxu1 }
 0x287   : > { %v1334_v47 = vpop.f32.mrb[9].mxu1 }
 0x288   : > { %v1242_v48 = vpack.c.bf16 %v948_v45, %v947_v44  ;;  %v1335_v49 = vadd.f32 %v1334_v47, %v1333_v46  ;;  %v1336_v50 = vpop.f32.mrb[10].mxu1 }
 0x289   : > { %v1337_v51 = vpop.f32.mrb[11].mxu1 }
 0x28a   : > { %1274 = vst [vmem:[%s1918_s5 + $0x8] sm:$0xff] %v1242_v48   ;;  %v933_v52 = vadd.f32 %v1335_v49, %v1911_v26  ;;  %v1338_v53 = vadd.f32 %v1337_v51, %v1336_v50 }
 0x28c   : > { %v934_v54 = vadd.f32 %v1338_v53, %v1911_v26  ;;  %v949_v55 = vmax.f32 %v933_v52, 0.0 }
 0x28e   : > { %v950_v56 = vmax.f32 %v934_v54, 0.0  ;;  %v1339_v57 = vpop.f32.mrb[12].mxu1 }
 0x28f   : > { %v1340_v58 = vpop.f32.mrb[13].mxu1 }
 0x290   : > { %v1247_v59 = vpack.c.bf16 %v950_v56, %v949_v55  ;;  %v1341_v60 = vadd.f32 %v1340_v58, %v1339_v57  ;;  %v1342_v61 = vpop.f32.mrb[14].mxu1 }
 0x291   : > { %v1343_v62 = vpop.f32.mrb[15].mxu1 }
 0x292   : > { %1275 = vst [vmem:[%s1918_s5 + $0x10] sm:$0xff] %v1247_v59   ;;  %v935_v63 = vadd.f32 %v1341_v60, %v1911_v26  ;;  %v1344_v0 = vadd.f32 %v1343_v62, %v1342_v61 }
 0x294   : > { %v936_v1 = vadd.f32 %v1344_v0, %v1911_v26  ;;  %v951_v2 = vmax.f32 %v935_v63, 0.0 }
 0x296   : > { %v952_v3 = vmax.f32 %v936_v1, 0.0  ;;  %v1345_v4 = vpop.f32.mrb[16].mxu1 }
 0x297   : > { %v1346_v5 = vpop.f32.mrb[17].mxu1 }
 0x298   : > { %v1252_v6 = vpack.c.bf16 %v952_v3, %v951_v2  ;;  %v1347_v7 = vadd.f32 %v1346_v5, %v1345_v4  ;;  %v1348_v8 = vpop.f32.mrb[18].mxu1 }
 0x299   : > { %v1349_v9 = vpop.f32.mrb[19].mxu1 }
 0x29a   : > { %1276 = vst [vmem:[%s1918_s5 + $0x18] sm:$0xff] %v1252_v6   ;;  %v937_v10 = vadd.f32 %v1347_v7, %v1911_v26  ;;  %v1350_v11 = vadd.f32 %v1349_v9, %v1348_v8 }
 0x29c   : > { %v938_v12 = vadd.f32 %v1350_v11, %v1911_v26  ;;  %v953_v13 = vmax.f32 %v937_v10, 0.0 }
 0x29e   : > { %v954_v14 = vmax.f32 %v938_v12, 0.0  ;;  %v1351_v15 = vpop.f32.mrb[20].mxu1 }
 0x29f   : > { %v1352_v16 = vpop.f32.mrb[21].mxu1 }
 0x2a0   : > { %v1257_v17 = vpack.c.bf16 %v954_v14, %v953_v13  ;;  %v1353_v18 = vadd.f32 %v1352_v16, %v1351_v15  ;;  %v1354_v19 = vpop.f32.mrb[22].mxu1 }
 0x2a1   : > { %v1355_v20 = vpop.f32.mrb[23].mxu1 }
 0x2a2   : > { %1277 = vst [vmem:[%s1918_s5 + $0x20] sm:$0xff] %v1257_v17   ;;  %v939_v21 = vadd.f32 %v1353_v18, %v1911_v26  ;;  %v1356_v22 = vadd.f32 %v1355_v20, %v1354_v19 }
 0x2a4   : > { %v940_v23 = vadd.f32 %v1356_v22, %v1911_v26  ;;  %v955_v24 = vmax.f32 %v939_v21, 0.0 }
 0x2a6   : > { %v956_v25 = vmax.f32 %v940_v23, 0.0  ;;  %v1357_v27 = vpop.f32.mrb[24].mxu1 }
 0x2a7   : > { %v1358_v28 = vpop.f32.mrb[25].mxu1 }
 0x2a8   : > { %v1262_v29 = vpack.c.bf16 %v956_v25, %v955_v24  ;;  %v1359_v30 = vadd.f32 %v1358_v28, %v1357_v27  ;;  %v1360_v31 = vpop.f32.mrb[26].mxu1 }
 0x2a9   : > { %v1361_v32 = vpop.f32.mrb[27].mxu1 }
 0x2aa   : > { %1278 = vst [vmem:[%s1918_s5 + $0x28] sm:$0xff] %v1262_v29   ;;  %v941_v33 = vadd.f32 %v1359_v30, %v1911_v26  ;;  %v1362_v34 = vadd.f32 %v1361_v32, %v1360_v31 }
 0x2ac   : > { %v942_v35 = vadd.f32 %v1362_v34, %v1911_v26  ;;  %v957_v36 = vmax.f32 %v941_v33, 0.0 }
 0x2ae   : > { %v958_v37 = vmax.f32 %v942_v35, 0.0  ;;  %v1363_v38 = vpop.f32.mrb[28].mxu1 }
 0x2af   : > { %v1364_v39 = vpop.f32.mrb[29].mxu1 }
 0x2b0   : > { %v1267_v40 = vpack.c.bf16 %v958_v37, %v957_v36  ;;  %v1365_v41 = vadd.f32 %v1364_v39, %v1363_v38  ;;  %v1366_v42 = vpop.f32.mrb[30].mxu1 }
 0x2b1   : > { %v1367_v43 = vpop.f32.mrb[31].mxu1 }
 0x2b2   : > { %1279 = vst [vmem:[%s1918_s5 + $0x30] sm:$0xff] %v1267_v40   ;;  %v943_v44 = vadd.f32 %v1365_v41, %v1911_v26  ;;  %v1368_v45 = vadd.f32 %v1367_v43, %v1366_v42 }
 0x2b4   : > { %v944_v46 = vadd.f32 %v1368_v45, %v1911_v26  ;;  %v959_v47 = vmax.f32 %v943_v44, 0.0 }
 0x2b6   : > { %v960_v48 = vmax.f32 %v944_v46, 0.0 }
 0x2b8   : > { %v1272_v49 = vpack.c.bf16 %v960_v48, %v959_v47 }
 0x2ba   : > { %1280 = vst [vmem:[%s1918_s5 + $0x38] sm:$0xff] %v1272_v49  }
 0x2bb PF: > { %s18_s20 = sadd.s32 1, %s1685_s20   ;;  %s1977_s15 = smov %s1669_s16 }
 0x2bc   : > { %p15_p9 = scmp.ge.s32.totalorder %s18_s20, 4   ;;  %s1978_s16 = smov %s1673_s17 }
 0x2bd   : > { %s1979_s17 = smov %s1835_s25  ;;  %s1980_s18 = smov %s1681_s19 }
 0x2be   : > { %s1981_s19 = smov %s1983_s10  ;;  %17 = sbr.rel (!%p15_p9) target bundleno = 5 (0x5), region = 93 }
 0x2c5   :  { %1063 = vsyncpa [#allocation4], 1 }
 0x2c6   :  { %1065 = vsyncpa [#allocation4 + $0x1], 1 }
 0x2c7   :  { %1066 = vsyncpa [#allocation6], 1 }

</bundles_post_ra>
